<compile_context>
chip_gen: v5e
topology: v5e:2x2
jax: 0.10.0
libtpu: 0.0.40
codegen_flags: <defaults>
</compile_context>

<pallas_src>
import functools

import numpy as np
import jax
import jax.numpy as jnp
from jax.experimental import pallas as pl
from jax.experimental.pallas import tpu as pltpu


def _block_kernel(x_ref, m_ref, b_ref, o_ref, *, K, H):
    # x_ref: (1, Hp, Wp*Cin)        one image's zero-padded rows
    # m_ref: (K, Wp*Cin, W*CoutT)   per-kh banded weights (kw + Cin folded in)
    # b_ref: (1, W*CoutT)           bias tiled over W
    # o_ref: (H, W*CoutT)           lane-dense output slab for this image
    x = x_ref[0]                                        # (Hp, Wp*Cin)
    acc = jnp.zeros(o_ref.shape, jnp.float32)
    for kh in range(K):                                 # static unroll (K=7)
        acc = acc + jnp.dot(x[kh:kh + H, :], m_ref[kh],
                            preferred_element_type=jnp.float32)
    o_ref[...] = jnp.maximum(acc + b_ref[...], 0.0).astype(o_ref.dtype)


def pack_block_params(params, *, in_channels, width):
    """One-time packing of the three conv branches (hoisted out of forward).

    params: list of (w_oihw, bias) with odd kernel sizes (here 3, 5, 7).
    Returns (M, bias_row):
      M:        (K, Wp*Cin, W*CoutT)  banded weights, K = max kernel size
      bias_row: (1, W*CoutT)
    """
    K = max(int(w.shape[-1]) for w, _ in params)
    Cin, W = in_channels, width
    CoutT = sum(int(w.shape[0]) for w, _ in params)
    Wp = W + K - 1

    # Zero-embed every branch into the common KxK footprint, concat on Cout.
    wc = jnp.zeros((K, K, Cin, CoutT), jnp.float32)
    biases = []
    c0 = 0
    for w_oihw, b in params:
        cout, _, k, _ = w_oihw.shape
        off = (K - k) // 2                              # center the kxk kernel
        w_hwio = jnp.transpose(w_oihw, (2, 3, 1, 0))    # OIHW -> HWIO, once
        wc = wc.at[off:off + k, off:off + k, :, c0:c0 + cout].set(w_hwio)
        biases.append(b)
        c0 += cout
    bias = jnp.concatenate(biases)                      # (CoutT,)

    # Banded expansion over the output-width axis:
    #   M[kh, wp*Cin+ci, w*CoutT+co] = wc[kh, wp-w, ci, co]  when 0 <= wp-w < K
    sel = (np.arange(Wp)[:, None, None]
           == np.arange(K)[None, :, None] + np.arange(W)[None, None, :])
    sel = jnp.asarray(sel, jnp.float32)                 # (Wp, K, W)
    m = jnp.einsum('pkw,hkcd->hpcwd', sel, wc)          # (K, Wp, Cin, W, CoutT)
    m = m.reshape(K, Wp * Cin, W * CoutT)
    bias_row = jnp.tile(bias, W).reshape(1, W * CoutT)
    return m, bias_row


def block_forward_nhwc(x_nhwc, packed):
    """Fused Block forward in NHWC: single pallas_call for all three branches."""
    m, bias_row = packed
    N, H, W, Cin = x_nhwc.shape
    K = m.shape[0]
    pad = (K - 1) // 2
    Hp, Wp = H + K - 1, W + K - 1
    CoutT = bias_row.shape[-1] // W

    # One shared zero-pad ('same' for the common 7x7 footprint), then a
    # layout-preserving collapse of (Wp, Cin) into the lane axis.
    xpad = jnp.pad(x_nhwc, ((0, 0), (pad, pad), (pad, pad), (0, 0)))
    xrows = xpad.reshape(N, Hp, Wp * Cin)

    out2 = pl.pallas_call(
        functools.partial(_block_kernel, K=K, H=H),
        out_shape=jax.ShapeDtypeStruct((N * H, W * CoutT), x_nhwc.dtype),
        grid=(N,),
        in_specs=[
            pl.BlockSpec((1, Hp, Wp * Cin), lambda n: (n, 0, 0)),
            pl.BlockSpec((K, Wp * Cin, W * CoutT), lambda n: (0, 0, 0)),
            pl.BlockSpec((1, W * CoutT), lambda n: (0, 0)),
        ],
        out_specs=pl.BlockSpec((H, W * CoutT), lambda n: (n, 0)),
        compiler_params=pltpu.CompilerParams(
            dimension_semantics=("parallel",)),  # shard batch over v7x's 2 TCs
    )(xrows, m, bias_row)

    return out2.reshape(N, H, W, CoutT)                 # layout-preserving


def block_forward(x_nchw, packed):
    # NCHW <-> NHWC only to match the PyTorch module's interface; in a real
    # model keep activations NHWC end-to-end and drop these transposes.
    x_nhwc = jnp.transpose(x_nchw, (0, 2, 3, 1))
    y_nhwc = block_forward_nhwc(x_nhwc, packed)
    return jnp.transpose(y_nhwc, (0, 3, 1, 2))


def _reference(x_nchw, params):
    x_nhwc = jnp.transpose(x_nchw, (0, 2, 3, 1))
    outs = []
    for w_oihw, b in params:
        w_hwio = jnp.transpose(w_oihw, (2, 3, 1, 0))
        y = jax.lax.conv_general_dilated(
            x_nhwc, w_hwio, (1, 1), "SAME",
            dimension_numbers=("NHWC", "HWIO", "NHWC"))
        outs.append(jnp.maximum(y + b, 0.0))
    return jnp.transpose(jnp.concatenate(outs, axis=-1), (0, 3, 1, 2))


if __name__ == "__main__":
    # Small shapes consistent with the module: N=2, Cin=4, Cout=8, 16x16.
    N, Cin, Cout, H, W = 2, 4, 8, 16, 16
    key = jax.random.PRNGKey(0)
    keys = jax.random.split(key, 7)

    x = jax.random.normal(keys[0], (N, Cin, H, W), jnp.float32)

    # Deterministic init mimicking nn.Conv2d default (uniform +-1/sqrt(fan_in)).
    # NOTE: the module's attribute names (conv1x1/3x3/5x5) do not match the
    # kernel sizes it actually constructs (3, 5, 7); we reproduce 3/5/7.
    params = []
    for i, K in enumerate((3, 5, 7)):
        fan_in = Cin * K * K
        bound = 1.0 / (fan_in ** 0.5)
        w = jax.random.uniform(keys[1 + 2 * i], (Cout, Cin, K, K),
                               jnp.float32, -bound, bound)
        b = jax.random.uniform(keys[2 + 2 * i], (Cout,),
                               jnp.float32, -bound, bound)
        params.append((w, b))

    # One-time parameter packing (outside the forward path / jit).
    packed = jax.block_until_ready(
        pack_block_params(params, in_channels=Cin, width=W))

    fwd = jax.jit(block_forward)
    y = fwd(x, packed)
    jax.block_until_ready(y)

    y_ref = _reference(x, params)
    assert y.shape == (N, 3 * Cout, H, W), y.shape
    assert jnp.allclose(y, y_ref, atol=1e-4, rtol=1e-4), "mismatch vs reference"

    print("KERNEL_OK")
</pallas_src>

<mosaic_0001>
module attributes {stable_mosaic.version = 11 : i64} {
  func.func @_block_kernel(%arg0: i32, %arg1: memref<1x22x88xf32, #tpu.memory_space<vmem>>, %arg2: memref<7x88x384xf32, #tpu.memory_space<vmem>>, %arg3: memref<1x384xf32, #tpu.memory_space<vmem>>, %arg4: memref<16x384xf32, #tpu.memory_space<vmem>>) attributes {dimension_semantics = [#tpu.dimension_semantics<parallel>], iteration_bounds = array<i64: 2>, scalar_prefetch = 0 : i64, scratch_operands = 0 : i64, tpu.core_type = #tpu.core_type<tc>, window_params = [{transform_indices = @transform_0, window_bounds = array<i64: 1, 22, 88>}, {pipeline_mode = #tpu.pipeline_mode<synchronous>, transform_indices = @transform_1, window_bounds = array<i64: 7, 88, 384>}, {pipeline_mode = #tpu.pipeline_mode<synchronous>, transform_indices = @transform_2, window_bounds = array<i64: 1, 384>}, {transform_indices = @transform_3, window_bounds = array<i64: 16, 384>}]} {
    %c0 = arith.constant 0 : index
    %c0_0 = arith.constant 0 : index
    %c0_1 = arith.constant 0 : index
    %0 = vector.load %arg1[%c0, %c0_0, %c0_1] : memref<1x22x88xf32, #tpu.memory_space<vmem>>, vector<1x22x88xf32>
    %1 = vector.shape_cast %0 : vector<1x22x88xf32> to vector<22x88xf32>
    %cst = arith.constant 0.000000e+00 : f32
    %2 = vector.broadcast %cst : f32 to vector<16x384xf32>
    %3 = vector.extract_strided_slice %1 {offsets = [0, 0], sizes = [16, 88], strides = [1, 1]} : vector<22x88xf32> to vector<16x88xf32>
    %c0_2 = arith.constant 0 : index
    %c0_3 = arith.constant 0 : index
    %c0_4 = arith.constant 0 : index
    %4 = vector.load %arg2[%c0_2, %c0_3, %c0_4] : memref<7x88x384xf32, #tpu.memory_space<vmem>>, vector<1x88x384xf32>
    %5 = vector.shape_cast %4 : vector<1x88x384xf32> to vector<88x384xf32>
    %cst_5 = arith.constant dense<0.000000e+00> : vector<16x384xf32>
    %6 = tpu.matmul %3, %5, %cst_5 {dimension_numbers = #tpu.dot_dimension_numbers<[1], [0], [0], [1], [0, 0, 1, 1], [], []>} : vector<16x88xf32>, vector<88x384xf32>, vector<16x384xf32> -> vector<16x384xf32>
    %7 = arith.addf %2, %6 : vector<16x384xf32>
    %8 = vector.extract_strided_slice %1 {offsets = [1, 0], sizes = [16, 88], strides = [1, 1]} : vector<22x88xf32> to vector<16x88xf32>
    %c1 = arith.constant 1 : index
    %c0_6 = arith.constant 0 : index
    %c0_7 = arith.constant 0 : index
    %9 = vector.load %arg2[%c1, %c0_6, %c0_7] : memref<7x88x384xf32, #tpu.memory_space<vmem>>, vector<1x88x384xf32>
    %10 = vector.shape_cast %9 : vector<1x88x384xf32> to vector<88x384xf32>
    %cst_8 = arith.constant dense<0.000000e+00> : vector<16x384xf32>
    %11 = tpu.matmul %8, %10, %cst_8 {dimension_numbers = #tpu.dot_dimension_numbers<[1], [0], [0], [1], [0, 0, 1, 1], [], []>} : vector<16x88xf32>, vector<88x384xf32>, vector<16x384xf32> -> vector<16x384xf32>
    %12 = arith.addf %7, %11 : vector<16x384xf32>
    %13 = vector.extract_strided_slice %1 {offsets = [2, 0], sizes = [16, 88], strides = [1, 1]} : vector<22x88xf32> to vector<16x88xf32>
    %c2 = arith.constant 2 : index
    %c0_9 = arith.constant 0 : index
    %c0_10 = arith.constant 0 : index
    %14 = vector.load %arg2[%c2, %c0_9, %c0_10] : memref<7x88x384xf32, #tpu.memory_space<vmem>>, vector<1x88x384xf32>
    %15 = vector.shape_cast %14 : vector<1x88x384xf32> to vector<88x384xf32>
    %cst_11 = arith.constant dense<0.000000e+00> : vector<16x384xf32>
    %16 = tpu.matmul %13, %15, %cst_11 {dimension_numbers = #tpu.dot_dimension_numbers<[1], [0], [0], [1], [0, 0, 1, 1], [], []>} : vector<16x88xf32>, vector<88x384xf32>, vector<16x384xf32> -> vector<16x384xf32>
    %17 = arith.addf %12, %16 : vector<16x384xf32>
    %18 = vector.extract_strided_slice %1 {offsets = [3, 0], sizes = [16, 88], strides = [1, 1]} : vector<22x88xf32> to vector<16x88xf32>
    %c3 = arith.constant 3 : index
    %c0_12 = arith.constant 0 : index
    %c0_13 = arith.constant 0 : index
    %19 = vector.load %arg2[%c3, %c0_12, %c0_13] : memref<7x88x384xf32, #tpu.memory_space<vmem>>, vector<1x88x384xf32>
    %20 = vector.shape_cast %19 : vector<1x88x384xf32> to vector<88x384xf32>
    %cst_14 = arith.constant dense<0.000000e+00> : vector<16x384xf32>
    %21 = tpu.matmul %18, %20, %cst_14 {dimension_numbers = #tpu.dot_dimension_numbers<[1], [0], [0], [1], [0, 0, 1, 1], [], []>} : vector<16x88xf32>, vector<88x384xf32>, vector<16x384xf32> -> vector<16x384xf32>
    %22 = arith.addf %17, %21 : vector<16x384xf32>
    %23 = vector.extract_strided_slice %1 {offsets = [4, 0], sizes = [16, 88], strides = [1, 1]} : vector<22x88xf32> to vector<16x88xf32>
    %c4 = arith.constant 4 : index
    %c0_15 = arith.constant 0 : index
    %c0_16 = arith.constant 0 : index
    %24 = vector.load %arg2[%c4, %c0_15, %c0_16] : memref<7x88x384xf32, #tpu.memory_space<vmem>>, vector<1x88x384xf32>
    %25 = vector.shape_cast %24 : vector<1x88x384xf32> to vector<88x384xf32>
    %cst_17 = arith.constant dense<0.000000e+00> : vector<16x384xf32>
    %26 = tpu.matmul %23, %25, %cst_17 {dimension_numbers = #tpu.dot_dimension_numbers<[1], [0], [0], [1], [0, 0, 1, 1], [], []>} : vector<16x88xf32>, vector<88x384xf32>, vector<16x384xf32> -> vector<16x384xf32>
    %27 = arith.addf %22, %26 : vector<16x384xf32>
    %28 = vector.extract_strided_slice %1 {offsets = [5, 0], sizes = [16, 88], strides = [1, 1]} : vector<22x88xf32> to vector<16x88xf32>
    %c5 = arith.constant 5 : index
    %c0_18 = arith.constant 0 : index
    %c0_19 = arith.constant 0 : index
    %29 = vector.load %arg2[%c5, %c0_18, %c0_19] : memref<7x88x384xf32, #tpu.memory_space<vmem>>, vector<1x88x384xf32>
    %30 = vector.shape_cast %29 : vector<1x88x384xf32> to vector<88x384xf32>
    %cst_20 = arith.constant dense<0.000000e+00> : vector<16x384xf32>
    %31 = tpu.matmul %28, %30, %cst_20 {dimension_numbers = #tpu.dot_dimension_numbers<[1], [0], [0], [1], [0, 0, 1, 1], [], []>} : vector<16x88xf32>, vector<88x384xf32>, vector<16x384xf32> -> vector<16x384xf32>
    %32 = arith.addf %27, %31 : vector<16x384xf32>
    %33 = vector.extract_strided_slice %1 {offsets = [6, 0], sizes = [16, 88], strides = [1, 1]} : vector<22x88xf32> to vector<16x88xf32>
    %c6 = arith.constant 6 : index
    %c0_21 = arith.constant 0 : index
    %c0_22 = arith.constant 0 : index
    %34 = vector.load %arg2[%c6, %c0_21, %c0_22] : memref<7x88x384xf32, #tpu.memory_space<vmem>>, vector<1x88x384xf32>
    %35 = vector.shape_cast %34 : vector<1x88x384xf32> to vector<88x384xf32>
    %cst_23 = arith.constant dense<0.000000e+00> : vector<16x384xf32>
    %36 = tpu.matmul %33, %35, %cst_23 {dimension_numbers = #tpu.dot_dimension_numbers<[1], [0], [0], [1], [0, 0, 1, 1], [], []>} : vector<16x88xf32>, vector<88x384xf32>, vector<16x384xf32> -> vector<16x384xf32>
    %37 = arith.addf %32, %36 : vector<16x384xf32>
    %c0_24 = arith.constant 0 : index
    %c0_25 = arith.constant 0 : index
    %38 = vector.load %arg3[%c0_24, %c0_25] : memref<1x384xf32, #tpu.memory_space<vmem>>, vector<1x384xf32>
    %39 = vector.broadcast %38 : vector<1x384xf32> to vector<16x384xf32>
    %40 = arith.addf %37, %39 : vector<16x384xf32>
    %cst_26 = arith.constant 0.000000e+00 : f32
    %41 = vector.broadcast %cst_26 : f32 to vector<16x384xf32>
    %42 = arith.maximumf %40, %41 : vector<16x384xf32>
    %c0_27 = arith.constant 0 : index
    %c0_28 = arith.constant 0 : index
    %43 = vector.load %arg4[%c0_27, %c0_28] : memref<16x384xf32, #tpu.memory_space<vmem>>, vector<16x384xf32>
    tpu.vector_store %arg4[%c0_27, %c0_28], %42 {strides = array<i32>} : memref<16x384xf32, #tpu.memory_space<vmem>>, vector<16x384xf32>,
    return
  }
  func.func @transform_0(%arg0: i32) -> (i32, i32, i32) {
    %c0_i32 = arith.constant 0 : i32
    %c0_i32_0 = arith.constant 0 : i32
    %c0_i32_1 = arith.constant 0 : i32
    return %arg0, %c0_i32, %c0_i32_0 : i32, i32, i32
  }
  func.func @transform_1(%arg0: i32) -> (i32, i32, i32) {
    %c0_i32 = arith.constant 0 : i32
    %c0_i32_0 = arith.constant 0 : i32
    %c0_i32_1 = arith.constant 0 : i32
    %c0_i32_2 = arith.constant 0 : i32
    return %c0_i32, %c0_i32_0, %c0_i32_1 : i32, i32, i32
  }
  func.func @transform_2(%arg0: i32) -> (i32, i32) {
    %c0_i32 = arith.constant 0 : i32
    %c0_i32_0 = arith.constant 0 : i32
    %c0_i32_1 = arith.constant 0 : i32
    return %c0_i32, %c0_i32_0 : i32, i32
  }
  func.func @transform_3(%arg0: i32) -> (i32, i32) {
    %c0_i32 = arith.constant 0 : i32
    %c0_i32_0 = arith.constant 0 : i32
    return %arg0, %c0_i32 : i32, i32
  }
}

</mosaic_0001>

<bundles_post_ra>
// kernel: block_forward.1
= control target key start
LH: loop header
LB: loop body
LE: loop exit
PB: predicated region body
PF: predicated region fallthrough
CT: control target
= control target key end

     0   :  { %8 = vsyncpa [#allocation3], 0  ;;  %s1261_s12 = smov 0   ;;  %s1421_s0 = inlined_call_operand.vmem [shape: f32[2,22,88], index: 0, kind: input, shape index: {}]   ;;  %s1422_s1 = inlined_call_operand.hbm [shape: f32[7,88,384], index: 1, kind: input, shape index: {}]   ;;  %s1423_s2 = inlined_call_operand.vmem [shape: f32[1,384], index: 2, kind: input, shape index: {}]   ;;  %s1424_s3 = inlined_call_operand.vmem [shape: f32[32,384], index: 3, kind: output, shape index: {}]  }
   0x1 LB: > { %s124_s15 = sshll.u32 %s1422_s1, 4  ;;  %s1270_s16 = sadd.s32 4294967295, %s1236_s12   ;;  %s1236_s12 = sphi %s1261_s12, %s14_s12   ;;  %s125_s15 = int_to_ptr.hbm [resolvable:$true] %s124_s15 }
   0x2   : > { %p1110_p0 = scmp.ge.s32.totalorder %s1236_s12, 1  ;;  %p113_p1 = scmp.lt.s32.totalorder %s1236_s12, 3 }
   0x3   : > { %p1183_p2 = scmp.eq.s32.totalorder %s1270_s16, 0  ;;  %s1238_s17 = smov [#allocation2]  }
   0x4   : > { %p114_p3 = pnand %p1110_p0, %p113_p1  ;;  %s126_s18 = sshll.u32 %s1238_s17, 4  ;;  %s127_s18 = int_to_ptr.vmem [resolvable:$true] %s126_s18 }
   0x5   : > { %s1239_s19 = smov 384   ;;  %s1240_s20 = smov 24  }
   0x6   : > { %p1179_p4 = pneg %p114_p3  ;;  %153 = sbr.rel (%p114_p3) target bundleno = 297 (0x129), region = 32 }
   0x8   : > { %p1180_p5 = pnand %p1183_p2, %p1179_p4 }
   0xa   : > { %1182 = dma.hbm_to_vmem [thread:$0]  (!%p1180_p5), %s125_s15, 29568, %s127_s18, [#allocation3], %s1239_s19, %s1239_s19, %s1240_s20  }
   0xb   : > { %1231 = dma.done.wait (%p1183_p2), [#allocation3], 29568  }
   0xc   : > { %1233 = vsyncadd (%p1183_p2), [#allocation3], 4294937728  ;;  %v258_v0 = vld [vmem:[#allocation2 + $0x1f8] sm:$0xff]  ;;  %v259_v1 = vld [vmem:[#allocation2 + $0x200] sm:$0xff]  ;;  %p179_p6 = scmp.lt.s32.totalorder %s1270_s16, 1  ;;  %vm264_vm0 = vcmask 1046528  }
   0xd   : > { %v260_v2 = vld [vmem:[#allocation2 + $0x208] sm:$0xff]  ;;  %280 = vmatpush.msra.mxu0 %v258_v0  ;;  %303 = vmatpush.msra.mxu1 %v259_v1  ;;  %v224_v3 = vld [vmem:[#allocation2 + $0xf0] sm:$0xff]  ;;  %v255_v4 = vld [vmem:[#allocation2 + $0x1e0] sm:$0xff]  ;;  %vm270_vm1 = vcmask 719872   ;;  %vm451_vm2 = vcmask 1045504   ;;  %vm570_vm3 = vcmask 1044480  }
   0xe   : > { %v256_v5 = vld [vmem:[#allocation2 + $0x1e8] sm:$0xff]  ;;  %326 = vmatpush.msra.mxu2 %v260_v2  ;;  %353 = vmatpush.msra.mxu3 %v224_v3  ;;  %v257_v6 = vld [vmem:[#allocation2 + $0x1f0] sm:$0xff]  ;;  %v221_v7 = vld [vmem:[#allocation2 + $0xd8] sm:$0xff]  ;;  %s1279_s21 = scalar_select %p179_p6, %s1270_s16, 1  ;;  %vm689_vm4 = vcmask 1043456   ;;  %vm808_vm5 = vcmask 1042432  }
   0xf   : > { %v252_v8 = vld [vmem:[#allocation2 + $0x1c8] sm:$0xff]  ;;  %281 = vmatpush.msra.mxu0 %v255_v4  ;;  %304 = vmatpush.msra.mxu1 %v256_v5  ;;  %v253_v9 = vld [vmem:[#allocation2 + $0x1d0] sm:$0xff]  ;;  %v254_v10 = vld [vmem:[#allocation2 + $0x1d8] sm:$0xff]  ;;  %vm927_vm6 = vcmask 1041408   ;;  %s1116_s26 = sshll.u32 %s1270_s16, 1 }
  0x10   : > { %v218_v11 = vld [vmem:[#allocation2 + $0xc0] sm:$0xff]  ;;  %327 = vmatpush.msra.mxu2 %v257_v6  ;;  %354 = vmatpush.msra.mxu3 %v221_v7  ;;  %v249_v12 = vld [vmem:[#allocation2 + $0x1b0] sm:$0xff]  ;;  %v250_v13 = vld [vmem:[#allocation2 + $0x1b8] sm:$0xff]  ;;  %s1173_s22 = smul.u32 24, %s1279_s21  ;;  %p185_p7 = scmp.lt.s32.totalorder %s1116_s26, 3 }
  0x11   : > { %282 = vmatpush.msra.mxu0 %v252_v8  ;;  %305 = vmatpush.msra.mxu1 %v253_v9  ;;  %v251_v14 = vld [vmem:[#allocation2 + $0x1c0] sm:$0xff]  ;;  %v215_v15 = vld [vmem:[#allocation2 + $0xa8] sm:$0xff]  ;;  %v246_v16 = vld [vmem:[#allocation2 + $0x198] sm:$0xff] }
  0x12   : > { %328 = vmatpush.msra.mxu2 %v254_v10  ;;  %355 = vmatpush.msra.mxu3 %v218_v11  ;;  %v247_v17 = vld [vmem:[#allocation2 + $0x1a0] sm:$0xff]  ;;  %v248_v18 = vld [vmem:[#allocation2 + $0x1a8] sm:$0xff]  ;;  %v212_v19 = vld [vmem:[#allocation2 + $0x90] sm:$0xff]  ;;  %s1285_s25 = scalar_lea.vmem %s1421_s0, %s1173_s22  ;;  %s1426_s26 = smov (!%p185_p7, %s1116_s26), 3 }
  0x13   : > { %283 = vmatpush.msra.mxu0 %v249_v12  ;;  %306 = vmatpush.msra.mxu1 %v250_v13  ;;  %v243_v20 = vld [vmem:[#allocation2 + $0x180] sm:$0xff]  ;;  %v244_v21 = vld [vmem:[#allocation2 + $0x188] sm:$0xff]  ;;  %v245_v22 = vld [vmem:[#allocation2 + $0x190] sm:$0xff]  ;;  %s1174_s29 = smul.u32 24, %s1426_s26 }
  0x14   : > { %329 = vmatpush.msra.mxu2 %v251_v14  ;;  %356 = vmatpush.msra.mxu3 %v215_v15  ;;  %v209_v23 = vld [vmem:[#allocation2 + $0x78] sm:$0xff]  ;;  %v240_v24 = vld [vmem:[#allocation2 + $0x168] sm:$0xff]  ;;  %v241_v25 = vld [vmem:[#allocation2 + $0x170] sm:$0xff] }
  0x15   : > { %284 = vmatpush.msra.mxu0 %v246_v16  ;;  %307 = vmatpush.msra.mxu1 %v247_v17  ;;  %v242_v26 = vld [vmem:[#allocation2 + $0x178] sm:$0xff]  ;;  %v206_v27 = vld [vmem:[#allocation2 + $0x60] sm:$0xff]  ;;  %v237_v28 = vld [vmem:[#allocation2 + $0x150] sm:$0xff]  ;;  %s1407_s5 = scalar_lea.vmem %s1424_s3, %s1174_s29 }
  0x16   : > { %330 = vmatpush.msra.mxu2 %v248_v18  ;;  %357 = vmatpush.msra.mxu3 %v212_v19  ;;  %v238_v29 = vld [vmem:[#allocation2 + $0x158] sm:$0xff]  ;;  %v239_v30 = vld [vmem:[#allocation2 + $0x160] sm:$0xff]  ;;  %v203_v31 = vld [vmem:[#allocation2 + $0x48] sm:$0xff] }
  0x17   : > { %285 = vmatpush.msra.mxu0 %v243_v20  ;;  %308 = vmatpush.msra.mxu1 %v244_v21  ;;  %v234_v32 = vld [vmem:[#allocation2 + $0x138] sm:$0xff]  ;;  %v235_v33 = vld [vmem:[#allocation2 + $0x140] sm:$0xff]  ;;  %v236_v34 = vld [vmem:[#allocation2 + $0x148] sm:$0xff] }
  0x18   : > { %331 = vmatpush.msra.mxu2 %v245_v22  ;;  %358 = vmatpush.msra.mxu3 %v209_v23  ;;  %v200_v35 = vld [vmem:[#allocation2 + $0x30] sm:$0xff]  ;;  %v231_v36 = vld [vmem:[#allocation2 + $0x120] sm:$0xff]  ;;  %v232_v37 = vld [vmem:[#allocation2 + $0x128] sm:$0xff] }
  0x19   : > { %286 = vmatpush.msra.mxu0 %v240_v24  ;;  %309 = vmatpush.msra.mxu1 %v241_v25  ;;  %v233_v38 = vld [vmem:[#allocation2 + $0x130] sm:$0xff]  ;;  %v197_v39 = vld [vmem:[#allocation2 + $0x18] sm:$0xff]  ;;  %v228_v40 = vld [vmem:[#allocation2 + $0x108] sm:$0xff] }
  0x1a   : > { %332 = vmatpush.msra.mxu2 %v242_v26  ;;  %359 = vmatpush.msra.mxu3 %v206_v27  ;;  %v229_v41 = vld [vmem:[#allocation2 + $0x110] sm:$0xff]  ;;  %v230_v42 = vld [vmem:[#allocation2 + $0x118] sm:$0xff]  ;;  %v194_v43 = vld [vmem:[#allocation2] sm:$0xff] }
  0x1b   : > { %287 = vmatpush.msra.mxu0 %v237_v28  ;;  %310 = vmatpush.msra.mxu1 %v238_v29  ;;  %v1288_v44 = vld [vmem:[%s1285_s25] sm:$0xff]  ;;  %v1291_v45 = vld [vmem:[%s1285_s25 + $0x8] sm:$0xff]  ;;  %v225_v46 = vld [vmem:[#allocation2 + $0xf8] sm:$0xff] }
  0x1c   : > { %333 = vmatpush.msra.mxu2 %v239_v30  ;;  %360 = vmatpush.msra.mxu3 %v203_v31  ;;  %v226_v47 = vld [vmem:[#allocation2 + $0x100] sm:$0xff]  ;;  %v449_v49 = vld [vmem:[#allocation2 + $0x308] sm:$0xff]  ;;  %v265_v52 = vrot.slane %v1288_v44, 1  ;;  %v266_v53 = vrot.slane %v1291_v45, 1  ;;  %v446_v55 = vld [vmem:[#allocation2 + $0x2f0] sm:$0xff]  ;;  %v452_v26 = vrot.slane %v1288_v44, 2 }
  0x1d   : > { %288 = vmatpush.msra.mxu0 %v234_v32  ;;  %311 = vmatpush.msra.mxu1 %v235_v33  ;;  %v448_v48 = vld [vmem:[#allocation2 + $0x300] sm:$0xff]  ;;  %v223_v51 = vld [vmem:[#allocation2 + $0xe8] sm:$0xff]  ;;  %v220_v57 = vld [vmem:[#allocation2 + $0xd0] sm:$0xff]  ;;  %v453_v27 = vrot.slane %v1291_v45, 2 }
  0x1e   : > { %334 = vmatpush.msra.mxu2 %v236_v34  ;;  %361 = vmatpush.msra.mxu3 %v200_v35  ;;  %v222_v50 = vld [vmem:[#allocation2 + $0xe0] sm:$0xff]  ;;  %v445_v54 = vld [vmem:[#allocation2 + $0x2e8] sm:$0xff]  ;;  %v442_v58 = vld [vmem:[#allocation2 + $0x2d0] sm:$0xff]  ;;  %v267_v60 = vsel %vm264_vm0, %v265_v52, %v266_v53 }
  0x1f   : > { %289 = vmatpush.msra.mxu0 %v231_v36  ;;  %312 = vmatpush.msra.mxu1 %v232_v37  ;;  %v219_v56 = vld [vmem:[#allocation2 + $0xc8] sm:$0xff]  ;;  %v443_v59 = vld [vmem:[#allocation2 + $0x2d8] sm:$0xff]  ;;  %v216_v62 = vld [vmem:[#allocation2 + $0xb0] sm:$0xff]  ;;  %v1314_v34 = vsel %vm451_vm2, %v452_v26, %v453_v27 }
  0x20   : > { %335 = vmatpush.msra.mxu2 %v233_v38  ;;  %362 = vmatpush.msra.mxu3 %v197_v39  ;;  %v217_v61 = vld [vmem:[#allocation2 + $0xb8] sm:$0xff]  ;;  %v440_v0 = vld [vmem:[#allocation2 + $0x2c0] sm:$0xff]  ;;  %v1300_v2 = vld [vmem:[%s1285_s25 + $0x10] sm:$0x3f] }
  0x21   : > { %290 = vmatpush.msra.mxu0 %v228_v40  ;;  %313 = vmatpush.msra.mxu1 %v229_v41  ;;  %v439_v63 = vld [vmem:[#allocation2 + $0x2b8] sm:$0xff]  ;;  %v214_v1 = vld [vmem:[#allocation2 + $0xa0] sm:$0xff]  ;;  %v437_v5 = vld [vmem:[#allocation2 + $0x2a8] sm:$0xff]  ;;  %v268_v8 = vrot.slane %v1300_v2, 1 }
  0x22   : > { %336 = vmatpush.msra.mxu2 %v230_v42  ;;  %363 = vmatpush.msra.mxu3 %v194_v43  ;;  %v213_v3 = vld [vmem:[#allocation2 + $0x98] sm:$0xff]  ;;  %v436_v4 = vld [vmem:[#allocation2 + $0x2a0] sm:$0xff]  ;;  %v211_v7 = vld [vmem:[#allocation2 + $0x88] sm:$0xff] }
  0x23   : > { %376 = vmatpush.msrb.mxu0 %v225_v46  ;;  %399 = vmatpush.msrb.mxu1 %v226_v47  ;;  %v210_v6 = vld [vmem:[#allocation2 + $0x80] sm:$0xff]  ;;  %v433_v9 = vld [vmem:[#allocation2 + $0x288] sm:$0xff]  ;;  %v434_v10 = vld [vmem:[#allocation2 + $0x290] sm:$0xff]  ;;  %v269_v15 = vsel %vm264_vm0, %v266_v53, %v268_v8 }
  0x24   : > { %466 = vmatpush.msrb.mxu2 %v448_v48  ;;  %489 = vmatpush.msrb.mxu3 %v449_v49  ;;  %v207_v11 = vld [vmem:[#allocation2 + $0x68] sm:$0xff]  ;;  %v208_v12 = vld [vmem:[#allocation2 + $0x70] sm:$0xff]  ;;  %v431_v14 = vld [vmem:[#allocation2 + $0x278] sm:$0xff]  ;;  %v455_v48 = vrot.slane %v1300_v2, 2 }
  0x25   : > { %377 = vmatpush.msrb.mxu0 %v222_v50  ;;  %400 = vmatpush.msrb.mxu1 %v223_v51  ;;  %v430_v13 = vld [vmem:[#allocation2 + $0x270] sm:$0xff]  ;;  %v205_v16 = vld [vmem:[#allocation2 + $0x58] sm:$0xff]  ;;  %v428_v19 = vld [vmem:[#allocation2 + $0x260] sm:$0xff] }
  0x26   : > { %467 = vmatpush.msrb.mxu2 %v445_v54  ;;  %490 = vmatpush.msrb.mxu3 %v446_v55  ;;  %v204_v17 = vld [vmem:[#allocation2 + $0x50] sm:$0xff]  ;;  %v427_v18 = vld [vmem:[#allocation2 + $0x258] sm:$0xff]  ;;  %v202_v20 = vld [vmem:[#allocation2 + $0x40] sm:$0xff]  ;;  %v1326_v54 = vsel %vm451_vm2, %v453_v27, %v455_v48 }
  0x27   : > { %378 = vmatpush.msrb.mxu0 %v219_v56  ;;  %401 = vmatpush.msrb.mxu1 %v220_v57  ;;  %v201_v21 = vld [vmem:[#allocation2 + $0x38] sm:$0xff]  ;;  %v424_v22 = vld [vmem:[#allocation2 + $0x240] sm:$0xff]  ;;  %v425_v23 = vld [vmem:[#allocation2 + $0x248] sm:$0xff] }
  0x28   : > { %468 = vmatpush.msrb.mxu2 %v442_v58  ;;  %491 = vmatpush.msrb.mxu3 %v443_v59  ;;  %v198_v24 = vld [vmem:[#allocation2 + $0x20] sm:$0xff]  ;;  %v199_v25 = vld [vmem:[#allocation2 + $0x28] sm:$0xff]  ;;  %v422_v29 = vld [vmem:[#allocation2 + $0x230] sm:$0xff] }
  0x29   : > { %1122 = vmatmul.msk.f32.vlgmr.msra.gmra.mxu2 %vm270_vm1, %v267_v60  ;;  %1124 = vmatmul.msk.f32.vlgmr.msra.gmra.mxu3 %vm270_vm1, %v1288_v44  ;;  %v421_v28 = vld [vmem:[#allocation2 + $0x228] sm:$0xff]  ;;  %v196_v31 = vld [vmem:[#allocation2 + $0x10] sm:$0xff]  ;;  %v419_v33 = vld [vmem:[#allocation2 + $0x218] sm:$0xff] }
  0x2a   : > { %1118 = vmatmul.msk.f32.vlgmr.msra.gmra.mxu0 %vm270_vm1, %v267_v60  ;;  %402 = vmatpush.msrb.mxu1 %v217_v61  ;;  %v195_v30 = vld [vmem:[#allocation2 + $0x8] sm:$0xff]  ;;  %v418_v32 = vld [vmem:[#allocation2 + $0x210] sm:$0xff]  ;;  %v569_v38 = vld [vmem:[#allocation2 + $0x418] sm:$0xff] }
  0x2b   : > { %379 = vmatpush.msrb.mxu0 %v216_v62  ;;  %469 = vmatpush.msrb.mxu2 %v439_v63  ;;  %v450_v35 = vld [vmem:[#allocation2 + $0x310] sm:$0xff]  ;;  %v567_v36 = vld [vmem:[#allocation2 + $0x408] sm:$0xff]  ;;  %v447_v40 = vld [vmem:[#allocation2 + $0x2f8] sm:$0xff] }
  0x2c   : > { %492 = vmatpush.msrb.mxu3 %v440_v0  ;;  %403 = vmatpush.msrb.mxu1 %v214_v1  ;;  %v568_v37 = vld [vmem:[#allocation2 + $0x410] sm:$0xff]  ;;  %v565_v41 = vld [vmem:[#allocation2 + $0x3f8] sm:$0xff]  ;;  %v566_v42 = vld [vmem:[#allocation2 + $0x400] sm:$0xff] }
  0x2d   : > { %380 = vmatpush.msrb.mxu0 %v213_v3  ;;  %470 = vmatpush.msrb.mxu2 %v436_v4  ;;  %v564_v39 = vld [vmem:[#allocation2 + $0x3f0] sm:$0xff]  ;;  %v561_v43 = vld [vmem:[#allocation2 + $0x3d8] sm:$0xff]  ;;  %v444_v46 = vld [vmem:[#allocation2 + $0x2e0] sm:$0xff] }
  0x2e   : > { %493 = vmatpush.msrb.mxu3 %v437_v5  ;;  %1120 = vmatmul.msk.f32.vlgmr.msra.gmra.mxu1 %vm270_vm1, %v267_v60  ;;  %v562_v47 = vld [vmem:[#allocation2 + $0x3e0] sm:$0xff]  ;;  %v563_v49 = vld [vmem:[#allocation2 + $0x3e8] sm:$0xff]  ;;  %v560_v53 = vld [vmem:[#allocation2 + $0x3d0] sm:$0xff] }
  0x2f   : > { %381 = vmatpush.msrb.mxu0 %v210_v6  ;;  %404 = vmatpush.msrb.mxu1 %v211_v7  ;;  %v441_v50 = vld [vmem:[#allocation2 + $0x2c8] sm:$0xff]  ;;  %v558_v51 = vld [vmem:[#allocation2 + $0x3c0] sm:$0xff]  ;;  %v438_v55 = vld [vmem:[#allocation2 + $0x2b0] sm:$0xff] }
  0x30   : > { %471 = vmatpush.msrb.mxu2 %v433_v9  ;;  %494 = vmatpush.msrb.mxu3 %v434_v10  ;;  %v559_v52 = vld [vmem:[#allocation2 + $0x3c8] sm:$0xff]  ;;  %v556_v57 = vld [vmem:[#allocation2 + $0x3b0] sm:$0xff]  ;;  %v557_v58 = vld [vmem:[#allocation2 + $0x3b8] sm:$0xff] }
  0x31   : > { %382 = vmatpush.msrb.mxu0 %v207_v11  ;;  %405 = vmatpush.msrb.mxu1 %v208_v12  ;;  %v555_v56 = vld [vmem:[#allocation2 + $0x3a8] sm:$0xff]  ;;  %v435_v59 = vld [vmem:[#allocation2 + $0x298] sm:$0xff]  ;;  %v552_v60 = vld [vmem:[#allocation2 + $0x390] sm:$0xff] }
  0x32   : > { %472 = vmatpush.msrb.mxu2 %v430_v13  ;;  %495 = vmatpush.msrb.mxu3 %v431_v14  ;;  %v553_v61 = vld [vmem:[#allocation2 + $0x398] sm:$0xff]  ;;  %v554_v62 = vld [vmem:[#allocation2 + $0x3a0] sm:$0xff]  ;;  %v551_v3 = vld [vmem:[#allocation2 + $0x388] sm:$0xff]  ;;  %v571_v14 = vrot.slane %v1288_v44, 3 }
  0x33   : > { %1123 = vmatmul.msk.f32.gmra.mxu2 %vm270_vm1, %v269_v15  ;;  %1125 = vmatmul.msk.f32.gmra.mxu3 %vm270_vm1, %v1291_v45  ;;  %v432_v63 = vld [vmem:[#allocation2 + $0x280] sm:$0xff]  ;;  %v549_v0 = vld [vmem:[#allocation2 + $0x378] sm:$0xff]  ;;  %v429_v4 = vld [vmem:[#allocation2 + $0x268] sm:$0xff] }
  0x34   : > { %1119 = vmatmul.msk.f32.gmra.mxu0 %vm270_vm1, %v269_v15  ;;  %406 = vmatpush.msrb.mxu1 %v205_v16  ;;  %v550_v1 = vld [vmem:[#allocation2 + $0x380] sm:$0xff]  ;;  %v547_v6 = vld [vmem:[#allocation2 + $0x368] sm:$0xff]  ;;  %v548_v7 = vld [vmem:[#allocation2 + $0x370] sm:$0xff] }
  0x35   : > { %383 = vmatpush.msrb.mxu0 %v204_v17  ;;  %473 = vmatpush.msrb.mxu2 %v427_v18  ;;  %v546_v5 = vld [vmem:[#allocation2 + $0x360] sm:$0xff]  ;;  %v426_v8 = vld [vmem:[#allocation2 + $0x250] sm:$0xff]  ;;  %v543_v9 = vld [vmem:[#allocation2 + $0x348] sm:$0xff] }
  0x36   : > { %496 = vmatpush.msrb.mxu3 %v428_v19  ;;  %407 = vmatpush.msrb.mxu1 %v202_v20  ;;  %v544_v10 = vld [vmem:[#allocation2 + $0x350] sm:$0xff]  ;;  %v545_v11 = vld [vmem:[#allocation2 + $0x358] sm:$0xff]  ;;  %v542_v17 = vld [vmem:[#allocation2 + $0x340] sm:$0xff] }
  0x37   : > { %384 = vmatpush.msrb.mxu0 %v201_v21  ;;  %474 = vmatpush.msrb.mxu2 %v424_v22  ;;  %v423_v12 = vld [vmem:[#allocation2 + $0x238] sm:$0xff]  ;;  %v540_v13 = vld [vmem:[#allocation2 + $0x330] sm:$0xff]  ;;  %v420_v18 = vld [vmem:[#allocation2 + $0x220] sm:$0xff] }
  0x38   : > { %497 = vmatpush.msrb.mxu3 %v425_v23  ;;  %1121 = vmatmul.msk.f32.gmra.mxu1 %vm270_vm1, %v269_v15  ;;  %v572_v15 = vrot.slane %v1291_v45, 3  ;;  %v541_v16 = vld [vmem:[#allocation2 + $0x338] sm:$0xff]  ;;  %v538_v20 = vld [vmem:[#allocation2 + $0x320] sm:$0xff]  ;;  %v539_v21 = vld [vmem:[#allocation2 + $0x328] sm:$0xff] }
  0x39   : > { %385 = vmatpush.msrb.mxu0 %v198_v24  ;;  %408 = vmatpush.msrb.mxu1 %v199_v25  ;;  %v537_v19 = vld [vmem:[#allocation2 + $0x318] sm:$0xff]  ;;  %v686_v23 = vld [vmem:[#allocation2 + $0x510] sm:$0xff]  ;;  %v688_v25 = vld [vmem:[#allocation2 + $0x520] sm:$0xff] }
  0x3a   : > { %475 = vmatpush.msrb.mxu2 %v421_v28  ;;  %498 = vmatpush.msrb.mxu3 %v422_v29  ;;  %v573_v22 = vsel %vm570_vm3, %v571_v14, %v572_v15  ;;  %v687_v24 = vld [vmem:[#allocation2 + $0x518] sm:$0xff]  ;;  %v684_v28 = vld [vmem:[#allocation2 + $0x500] sm:$0xff]  ;;  %v685_v29 = vld [vmem:[#allocation2 + $0x508] sm:$0xff] }
  0x3b   : > { %386 = vmatpush.msrb.mxu0 %v195_v30  ;;  %409 = vmatpush.msrb.mxu1 %v196_v31  ;;  %v805_v26 = vld [vmem:[#allocation2 + $0x618] sm:$0xff]  ;;  %v802_v30 = vld [vmem:[#allocation2 + $0x600] sm:$0xff] }
  0x3c   : > { %476 = vmatpush.msrb.mxu2 %v418_v32  ;;  %499 = vmatpush.msrb.mxu3 %v419_v33  ;;  %v683_v27 = vld [vmem:[#allocation2 + $0x4f8] sm:$0xff]  ;;  %v680_v31 = vld [vmem:[#allocation2 + $0x4e0] sm:$0xff]  ;;  %v681_v32 = vld [vmem:[#allocation2 + $0x4e8] sm:$0xff]  ;;  %v574_v33 = vrot.slane %v1300_v2, 3 }
  0x3d   : > { %1130 = vmatmul.msk.f32.vlgmr.msrb.gmra.mxu2 %vm270_vm1, %v1314_v34  ;;  %1132 = vmatmul.msk.f32.vlgmr.msrb.gmra.mxu3 %vm270_vm1, %v1314_v34  ;;  %v672_v48 = vld [vmem:[#allocation2 + $0x4a0] sm:$0xff] }
  0x3e   : > { %512 = vmatpush.msra.mxu0 %v450_v35  ;;  %585 = vmatpush.msra.mxu1 %v567_v36  ;;  %v799_v35 = vld [vmem:[#allocation2 + $0x5e8] sm:$0xff]  ;;  %v806_v14 = vld [vmem:[#allocation2 + $0x620] sm:$0xff] }
  0x3f   : > { %608 = vmatpush.msra.mxu2 %v568_v37  ;;  %631 = vmatpush.msra.mxu3 %v569_v38  ;;  %v677_v36 = vld [vmem:[#allocation2 + $0x4c8] sm:$0xff]  ;;  %v678_v37 = vld [vmem:[#allocation2 + $0x4d0] sm:$0xff]  ;;  %v679_v38 = vld [vmem:[#allocation2 + $0x4d8] sm:$0xff] }
  0x40   : > { %1126 = vmatmul.msk.f32.vlgmr.msrb.gmra.mxu0 %vm270_vm1, %v1288_v44  ;;  %586 = vmatpush.msra.mxu1 %v564_v39  ;;  %v796_v39 = vld [vmem:[#allocation2 + $0x5d0] sm:$0xff] }
  0x41   : > { %513 = vmatpush.msra.mxu0 %v447_v40  ;;  %609 = vmatpush.msra.mxu2 %v565_v41  ;;  %v575_v40 = vsel %vm570_vm3, %v572_v15, %v574_v33  ;;  %v674_v41 = vld [vmem:[#allocation2 + $0x4b0] sm:$0xff]  ;;  %v807_v15 = vld [vmem:[#allocation2 + $0x628] sm:$0xff] }
  0x42   : > { %632 = vmatpush.msra.mxu3 %v566_v42  ;;  %587 = vmatpush.msra.mxu1 %v561_v43  ;;  %v675_v42 = vld [vmem:[#allocation2 + $0x4b8] sm:$0xff]  ;;  %v676_v43 = vld [vmem:[#allocation2 + $0x4c0] sm:$0xff] }
  0x43   : > { %514 = vmatpush.msra.mxu0 %v444_v46  ;;  %610 = vmatpush.msra.mxu2 %v562_v47  ;;  %v793_v46 = vld [vmem:[#allocation2 + $0x5b8] sm:$0xff] }
  0x44   : > { %633 = vmatpush.msra.mxu3 %v563_v49  ;;  %1128 = vmatmul.msk.f32.vlgmr.msrb.gmra.mxu1 %vm270_vm1, %v1288_v44  ;;  %v671_v47 = vld [vmem:[#allocation2 + $0x498] sm:$0xff]  ;;  %v673_v49 = vld [vmem:[#allocation2 + $0x4a8] sm:$0xff] }
  0x45   : > { %515 = vmatpush.msra.mxu0 %v441_v50  ;;  %588 = vmatpush.msra.mxu1 %v558_v51  ;;  %v790_v50 = vld [vmem:[#allocation2 + $0x5a0] sm:$0xff] }
  0x46   : > { %611 = vmatpush.msra.mxu2 %v559_v52  ;;  %634 = vmatpush.msra.mxu3 %v560_v53  ;;  %v668_v51 = vld [vmem:[#allocation2 + $0x480] sm:$0xff]  ;;  %v669_v52 = vld [vmem:[#allocation2 + $0x488] sm:$0xff]  ;;  %v670_v53 = vld [vmem:[#allocation2 + $0x490] sm:$0xff] }
  0x47   : > { %1131 = vmatmul.msk.f32.gmra.mxu2 %vm270_vm1, %v1326_v54  ;;  %516 = vmatpush.msra.mxu0 %v438_v55  ;;  %v665_v55 = vld [vmem:[#allocation2 + $0x468] sm:$0xff] }
  0x48   : > { %589 = vmatpush.msra.mxu1 %v555_v56  ;;  %612 = vmatpush.msra.mxu2 %v556_v57  ;;  %v666_v56 = vld [vmem:[#allocation2 + $0x470] sm:$0xff]  ;;  %v667_v57 = vld [vmem:[#allocation2 + $0x478] sm:$0xff] }
  0x49   : > { %635 = vmatpush.msra.mxu3 %v557_v58  ;;  %517 = vmatpush.msra.mxu0 %v435_v59  ;;  %v784_v58 = vld [vmem:[#allocation2 + $0x570] sm:$0xff] }
  0x4a   : > { %1133 = vmatmul.msk.f32.gmra.mxu3 %vm270_vm1, %v1326_v54  ;;  %590 = vmatpush.msra.mxu1 %v552_v60  ;;  %v662_v59 = vld [vmem:[#allocation2 + $0x450] sm:$0xff]  ;;  %v663_v60 = vld [vmem:[#allocation2 + $0x458] sm:$0xff] }
  0x4b   : > { %613 = vmatpush.msra.mxu2 %v553_v61  ;;  %636 = vmatpush.msra.mxu3 %v554_v62  ;;  %v664_v61 = vld [vmem:[#allocation2 + $0x460] sm:$0xff]  ;;  %v781_v62 = vld [vmem:[#allocation2 + $0x558] sm:$0xff] }
  0x4c   : > { %518 = vmatpush.msra.mxu0 %v432_v63  ;;  %591 = vmatpush.msra.mxu1 %v549_v0  ;;  %v659_v63 = vld [vmem:[#allocation2 + $0x438] sm:$0xff]  ;;  %v660_v0 = vld [vmem:[#allocation2 + $0x440] sm:$0xff] }
  0x4d   : > { %614 = vmatpush.msra.mxu2 %v550_v1  ;;  %637 = vmatpush.msra.mxu3 %v551_v3  ;;  %v690_v1 = vrot.slane %v1288_v44, 4  ;;  %v691_v3 = vrot.slane %v1291_v45, 4 }
  0x4e   : > { %1127 = vmatmul.msk.f32.gmra.mxu0 %vm270_vm1, %v1291_v45  ;;  %1129 = vmatmul.msk.f32.gmra.mxu1 %vm270_vm1, %v1291_v45 }
  0x4f   : > { %519 = vmatpush.msra.mxu0 %v429_v4  ;;  %592 = vmatpush.msra.mxu1 %v546_v5  ;;  %v661_v4 = vld [vmem:[#allocation2 + $0x448] sm:$0xff]  ;;  %v778_v5 = vld [vmem:[#allocation2 + $0x540] sm:$0xff] }
  0x50   : > { %615 = vmatpush.msra.mxu2 %v547_v6  ;;  %638 = vmatpush.msra.mxu3 %v548_v7  ;;  %v809_v6 = vrot.slane %v1288_v44, 5  ;;  %v810_v7 = vrot.slane %v1291_v45, 5 }
  0x51   : > { %520 = vmatpush.msra.mxu0 %v426_v8  ;;  %593 = vmatpush.msra.mxu1 %v543_v9  ;;  %v656_v8 = vld [vmem:[#allocation2 + $0x420] sm:$0xff]  ;;  %v657_v9 = vld [vmem:[#allocation2 + $0x428] sm:$0xff] }
  0x52   : > { %616 = vmatpush.msra.mxu2 %v544_v10  ;;  %639 = vmatpush.msra.mxu3 %v545_v11  ;;  %v658_v10 = vld [vmem:[#allocation2 + $0x430] sm:$0xff]  ;;  %v775_v11 = vld [vmem:[#allocation2 + $0x528] sm:$0xff] }
  0x53   : > { %521 = vmatpush.msra.mxu0 %v423_v12  ;;  %594 = vmatpush.msra.mxu1 %v540_v13  ;;  %v692_v12 = vsel %vm689_vm4, %v690_v1, %v691_v3  ;;  %v1357_v13 = vsel %vm808_vm5, %v809_v6, %v810_v7  ;;  %v895_v1 = vld [vmem:[#allocation2 + $0x638] sm:$0xff]  ;;  %v917_v6 = vld [vmem:[#allocation2 + $0x6e8] sm:$0xff] }
  0x54   : > { %617 = vmatpush.msra.mxu2 %v541_v16  ;;  %640 = vmatpush.msra.mxu3 %v542_v17  ;;  %v924_v16 = vld [vmem:[#allocation2 + $0x720] sm:$0xff]  ;;  %v925_v17 = vld [vmem:[#allocation2 + $0x728] sm:$0xff] }
  0x55   : > { %522 = vmatpush.msra.mxu0 %v420_v18  ;;  %595 = vmatpush.msra.mxu1 %v537_v19  ;;  %v803_v18 = vld [vmem:[#allocation2 + $0x608] sm:$0xff]  ;;  %v804_v19 = vld [vmem:[#allocation2 + $0x610] sm:$0xff] }
  0x56   : > { %618 = vmatpush.msra.mxu2 %v538_v20  ;;  %641 = vmatpush.msra.mxu3 %v539_v21  ;;  %v921_v20 = vld [vmem:[#allocation2 + $0x708] sm:$0xff]  ;;  %v922_v21 = vld [vmem:[#allocation2 + $0x710] sm:$0xff] }
  0x57   : > { %1134 = vmatmul.msk.f32.vlgmr.msra.gmra.mxu0 %vm270_vm1, %v1314_v34  ;;  %1136 = vmatmul.msk.f32.vlgmr.msra.gmra.mxu1 %vm270_vm1, %v573_v22  ;;  %v682_v34 = vld [vmem:[#allocation2 + $0x4f0] sm:$0xff] }
  0x58   : > { %1138 = vmatmul.msk.f32.vlgmr.msra.gmra.mxu2 %vm270_vm1, %v573_v22  ;;  %1140 = vmatmul.msk.f32.vlgmr.msra.gmra.mxu3 %vm270_vm1, %v573_v22  ;;  %v800_v22 = vld [vmem:[#allocation2 + $0x5f0] sm:$0xff] }
  0x59   : > { %704 = vmatpush.msrb.mxu0 %v686_v23  ;;  %727 = vmatpush.msrb.mxu1 %v687_v24  ;;  %v801_v23 = vld [vmem:[#allocation2 + $0x5f8] sm:$0xff]  ;;  %v693_v24 = vrot.slane %v1300_v2, 4 }
  0x5a   : > { %750 = vmatpush.msrb.mxu2 %v688_v25  ;;  %823 = vmatpush.msrb.mxu3 %v805_v26  ;;  %v918_v25 = vld [vmem:[#allocation2 + $0x6f0] sm:$0xff]  ;;  %v919_v26 = vld [vmem:[#allocation2 + $0x6f8] sm:$0xff] }
  0x5b   : > { %705 = vmatpush.msrb.mxu0 %v683_v27  ;;  %728 = vmatpush.msrb.mxu1 %v684_v28  ;;  %v812_v27 = vrot.slane %v1300_v2, 5  ;;  %v797_v28 = vld [vmem:[#allocation2 + $0x5d8] sm:$0xff] }
  0x5c   : > { %751 = vmatpush.msrb.mxu2 %v685_v29  ;;  %824 = vmatpush.msrb.mxu3 %v802_v30  ;;  %v798_v29 = vld [vmem:[#allocation2 + $0x5e0] sm:$0xff]  ;;  %v915_v30 = vld [vmem:[#allocation2 + $0x6d8] sm:$0xff] }
  0x5d   : > { %706 = vmatpush.msrb.mxu0 %v680_v31  ;;  %729 = vmatpush.msrb.mxu1 %v681_v32  ;;  %v916_v31 = vld [vmem:[#allocation2 + $0x6e0] sm:$0xff]  ;;  %v694_v32 = vsel %vm689_vm4, %v691_v3, %v693_v24  ;;  %v1368_v33 = vsel %vm808_vm5, %v810_v7, %v812_v27 }
  0x5e   : > { %752 = vmatpush.msrb.mxu2 %v682_v34  ;;  %825 = vmatpush.msrb.mxu3 %v799_v35  ;;  %v794_v34 = vld [vmem:[#allocation2 + $0x5c0] sm:$0xff]  ;;  %v795_v35 = vld [vmem:[#allocation2 + $0x5c8] sm:$0xff] }
  0x5f   : > { %707 = vmatpush.msrb.mxu0 %v677_v36  ;;  %730 = vmatpush.msrb.mxu1 %v678_v37  ;;  %v912_v36 = vld [vmem:[#allocation2 + $0x6c0] sm:$0xff]  ;;  %v913_v37 = vld [vmem:[#allocation2 + $0x6c8] sm:$0xff] }
  0x60   : > { %753 = vmatpush.msrb.mxu2 %v679_v38  ;;  %826 = vmatpush.msrb.mxu3 %v796_v39  ;;  %v791_v38 = vld [vmem:[#allocation2 + $0x5a8] sm:$0xff]  ;;  %v792_v39 = vld [vmem:[#allocation2 + $0x5b0] sm:$0xff] }
  0x61   : > { %1135 = vmatmul.msk.f32.gmra.mxu0 %vm270_vm1, %v1326_v54  ;;  %1137 = vmatmul.msk.f32.gmra.mxu1 %vm270_vm1, %v575_v40  ;;  %v787_v54 = vld [vmem:[#allocation2 + $0x588] sm:$0xff] }
  0x62   : > { %1139 = vmatmul.msk.f32.gmra.mxu2 %vm270_vm1, %v575_v40  ;;  %1141 = vmatmul.msk.f32.gmra.mxu3 %vm270_vm1, %v575_v40  ;;  %v909_v40 = vld [vmem:[#allocation2 + $0x6a8] sm:$0xff] }
  0x63   : > { %708 = vmatpush.msrb.mxu0 %v674_v41  ;;  %731 = vmatpush.msrb.mxu1 %v675_v42  ;;  %v910_v41 = vld [vmem:[#allocation2 + $0x6b0] sm:$0xff] }
  0x64   : > { %754 = vmatpush.msrb.mxu2 %v676_v43  ;;  %827 = vmatpush.msrb.mxu3 %v793_v46  ;;  %v788_v42 = vld [vmem:[#allocation2 + $0x590] sm:$0xff]  ;;  %v789_v43 = vld [vmem:[#allocation2 + $0x598] sm:$0xff] }
  0x65   : > { %709 = vmatpush.msrb.mxu0 %v671_v47  ;;  %732 = vmatpush.msrb.mxu1 %v672_v48  ;;  %v906_v46 = vld [vmem:[#allocation2 + $0x690] sm:$0xff]  ;;  %v907_v47 = vld [vmem:[#allocation2 + $0x698] sm:$0xff] }
  0x66   : > { %755 = vmatpush.msrb.mxu2 %v673_v49  ;;  %828 = vmatpush.msrb.mxu3 %v790_v50  ;;  %v785_v48 = vld [vmem:[#allocation2 + $0x578] sm:$0xff]  ;;  %v786_v49 = vld [vmem:[#allocation2 + $0x580] sm:$0xff] }
  0x67   : > { %710 = vmatpush.msrb.mxu0 %v668_v51  ;;  %733 = vmatpush.msrb.mxu1 %v669_v52  ;;  %v903_v50 = vld [vmem:[#allocation2 + $0x678] sm:$0xff]  ;;  %v904_v51 = vld [vmem:[#allocation2 + $0x680] sm:$0xff] }
  0x68   : > { %756 = vmatpush.msrb.mxu2 %v670_v53  ;;  %829 = vmatpush.msrb.mxu3 %v787_v54  ;;  %v782_v52 = vld [vmem:[#allocation2 + $0x560] sm:$0xff]  ;;  %v783_v53 = vld [vmem:[#allocation2 + $0x568] sm:$0xff] }
  0x69   : > { %711 = vmatpush.msrb.mxu0 %v665_v55  ;;  %734 = vmatpush.msrb.mxu1 %v666_v56  ;;  %v900_v54 = vld [vmem:[#allocation2 + $0x660] sm:$0xff]  ;;  %v901_v55 = vld [vmem:[#allocation2 + $0x668] sm:$0xff] }
  0x6a   : > { %757 = vmatpush.msrb.mxu2 %v667_v57  ;;  %830 = vmatpush.msrb.mxu3 %v784_v58  ;;  %v779_v56 = vld [vmem:[#allocation2 + $0x548] sm:$0xff]  ;;  %v780_v57 = vld [vmem:[#allocation2 + $0x550] sm:$0xff] }
  0x6b   : > { %712 = vmatpush.msrb.mxu0 %v662_v59  ;;  %735 = vmatpush.msrb.mxu1 %v663_v60  ;;  %v897_v58 = vld [vmem:[#allocation2 + $0x648] sm:$0xff]  ;;  %v898_v59 = vld [vmem:[#allocation2 + $0x650] sm:$0xff]  ;;  %v928_v60 = vrot.slane %v1288_v44, 6 }
  0x6c   : > { %758 = vmatpush.msrb.mxu2 %v664_v61  ;;  %831 = vmatpush.msrb.mxu3 %v781_v62  ;;  %v929_v61 = vrot.slane %v1291_v45, 6  ;;  %v776_v62 = vld [vmem:[#allocation2 + $0x530] sm:$0xff]  ;;  %v923_v45 = vld [vmem:[#allocation2 + $0x718] sm:$0xff] }
  0x6d   : > { %713 = vmatpush.msrb.mxu0 %v659_v63  ;;  %736 = vmatpush.msrb.mxu1 %v660_v0  ;;  %v777_v63 = vld [vmem:[#allocation2 + $0x538] sm:$0xff]  ;;  %v894_v0 = vld [vmem:[#allocation2 + $0x630] sm:$0xff] }
  0x6e   : > { %759 = vmatpush.msrb.mxu2 %v661_v4  ;;  %832 = vmatpush.msrb.mxu3 %v778_v5  ;;  %v930_v3 = vsel %vm927_vm6, %v928_v60, %v929_v61  ;;  %v926_v44 = vld [vmem:[#allocation2 + $0x730] sm:$0xff]  ;;  %v920_v4 = vld [vmem:[#allocation2 + $0x700] sm:$0xff]  ;;  %v931_v5 = vrot.slane %v1300_v2, 6  ;;  %v911_v2 = vld [vmem:[#allocation2 + $0x6b8] sm:$0xff] }
  0x6f   : > { %714 = vmatpush.msrb.mxu0 %v656_v8  ;;  %737 = vmatpush.msrb.mxu1 %v657_v9  ;;  %v914_v8 = vld [vmem:[#allocation2 + $0x6d0] sm:$0xff]  ;;  %v908_v9 = vld [vmem:[#allocation2 + $0x6a0] sm:$0xff] }
  0x70   : > { %760 = vmatpush.msrb.mxu2 %v658_v10  ;;  %833 = vmatpush.msrb.mxu3 %v775_v11  ;;  %v932_v7 = vsel %vm927_vm6, %v929_v61, %v931_v5  ;;  %v905_v10 = vld [vmem:[#allocation2 + $0x688] sm:$0xff]  ;;  %v902_v11 = vld [vmem:[#allocation2 + $0x670] sm:$0xff] }
  0x71   : > { %1142 = vmatmul.msk.f32.vlgmr.msrb.gmra.mxu0 %vm270_vm1, %v692_v12  ;;  %1144 = vmatmul.msk.f32.vlgmr.msrb.gmra.mxu1 %vm270_vm1, %v692_v12 }
  0x72   : > { %1146 = vmatmul.msk.f32.vlgmr.msrb.gmra.mxu2 %vm270_vm1, %v692_v12  ;;  %1148 = vmatmul.msk.f32.vlgmr.msrb.gmra.mxu3 %vm270_vm1, %v1357_v13  ;;  %v899_v12 = vld [vmem:[#allocation2 + $0x658] sm:$0xff] }
  0x73   : > { %846 = vmatpush.msra.mxu0 %v806_v14  ;;  %869 = vmatpush.msra.mxu1 %v807_v15 }
  0x74   : > { %942 = vmatpush.msra.mxu2 %v924_v16  ;;  %965 = vmatpush.msra.mxu3 %v925_v17 }
  0x75   : > { %847 = vmatpush.msra.mxu0 %v803_v18  ;;  %870 = vmatpush.msra.mxu1 %v804_v19 }
  0x76   : > { %943 = vmatpush.msra.mxu2 %v921_v20  ;;  %966 = vmatpush.msra.mxu3 %v922_v21 }
  0x77   : > { %848 = vmatpush.msra.mxu0 %v800_v22  ;;  %871 = vmatpush.msra.mxu1 %v801_v23 }
  0x78   : > { %944 = vmatpush.msra.mxu2 %v918_v25  ;;  %967 = vmatpush.msra.mxu3 %v919_v26 }
  0x79   : > { %849 = vmatpush.msra.mxu0 %v797_v28  ;;  %872 = vmatpush.msra.mxu1 %v798_v29 }
  0x7a   : > { %945 = vmatpush.msra.mxu2 %v915_v30  ;;  %968 = vmatpush.msra.mxu3 %v916_v31 }
  0x7b   : > { %1143 = vmatmul.msk.f32.gmra.mxu0 %vm270_vm1, %v694_v32  ;;  %1145 = vmatmul.msk.f32.gmra.mxu1 %vm270_vm1, %v694_v32 }
  0x7c   : > { %1147 = vmatmul.msk.f32.gmra.mxu2 %vm270_vm1, %v694_v32  ;;  %1149 = vmatmul.msk.f32.gmra.mxu3 %vm270_vm1, %v1368_v33 }
  0x7d   : > { %850 = vmatpush.msra.mxu0 %v794_v34  ;;  %873 = vmatpush.msra.mxu1 %v795_v35 }
  0x7e   : > { %946 = vmatpush.msra.mxu2 %v912_v36  ;;  %969 = vmatpush.msra.mxu3 %v913_v37 }
  0x7f   : > { %851 = vmatpush.msra.mxu0 %v791_v38  ;;  %874 = vmatpush.msra.mxu1 %v792_v39 }
  0x80   : > { %947 = vmatpush.msra.mxu2 %v909_v40  ;;  %970 = vmatpush.msra.mxu3 %v910_v41 }
  0x81   : > { %852 = vmatpush.msra.mxu0 %v788_v42  ;;  %875 = vmatpush.msra.mxu1 %v789_v43 }
  0x82   : > { %948 = vmatpush.msra.mxu2 %v906_v46  ;;  %971 = vmatpush.msra.mxu3 %v907_v47 }
  0x83   : > { %853 = vmatpush.msra.mxu0 %v785_v48  ;;  %876 = vmatpush.msra.mxu1 %v786_v49 }
  0x84   : > { %949 = vmatpush.msra.mxu2 %v903_v50  ;;  %972 = vmatpush.msra.mxu3 %v904_v51 }
  0x85   : > { %854 = vmatpush.msra.mxu0 %v782_v52  ;;  %877 = vmatpush.msra.mxu1 %v783_v53 }
  0x86   : > { %950 = vmatpush.msra.mxu2 %v900_v54  ;;  %973 = vmatpush.msra.mxu3 %v901_v55  ;;  %v1012_v55 = vld [vmem:[%s1423_s2] sm:$0x7] }
  0x87   : > { %855 = vmatpush.msra.mxu0 %v779_v56  ;;  %878 = vmatpush.msra.mxu1 %v780_v57 }
  0x88   : > { %951 = vmatpush.msra.mxu2 %v897_v58  ;;  %974 = vmatpush.msra.mxu3 %v898_v59 }
  0x89   : > { %856 = vmatpush.msra.mxu0 %v776_v62  ;;  %879 = vmatpush.msra.mxu1 %v777_v63  ;;  %v1014_v63 = vperm.slane %v1012_v55, 0 }
  0x8a   : > { %952 = vmatpush.msra.mxu2 %v894_v0  ;;  %975 = vmatpush.msra.mxu3 %v895_v1  ;;  %v1015_v0 = vperm.slane %v1012_v55, 1 }
  0x8b   : > { %1150 = vmatmul.msk.f32.vlgmr.msra.gmra.mxu0 %vm270_vm1, %v1357_v13  ;;  %1152 = vmatmul.msk.f32.vlgmr.msra.gmra.mxu1 %vm270_vm1, %v1357_v13  ;;  %v896_v13 = vld [vmem:[#allocation2 + $0x640] sm:$0xff] }
  0x8c   : > { %1154 = vmatmul.msk.f32.vlgmr.msra.gmra.mxu2 %vm270_vm1, %v930_v3  ;;  %1156 = vmatmul.msk.f32.vlgmr.msra.gmra.mxu3 %vm270_vm1, %v930_v3 }
  0x8d   : > { %988 = vmatpush.msrb.mxu0 %v926_v44  ;;  %1162 = vmatpush.msrb.mxu1 %v926_v44 }
  0x8f   : > { %989 = vmatpush.msrb.mxu0 %v923_v45  ;;  %1163 = vmatpush.msrb.mxu1 %v923_v45 }
  0x91   : > { %990 = vmatpush.msrb.mxu0 %v920_v4  ;;  %1164 = vmatpush.msrb.mxu1 %v920_v4 }
  0x93   : > { %991 = vmatpush.msrb.mxu0 %v917_v6  ;;  %1165 = vmatpush.msrb.mxu1 %v917_v6 }
  0x94   : > { %1151 = vmatmul.msk.f32.gmra.mxu0 %vm270_vm1, %v1368_v33  ;;  %1153 = vmatmul.msk.f32.gmra.mxu1 %vm270_vm1, %v1368_v33 }
  0x95   : > { %1155 = vmatmul.msk.f32.gmra.mxu2 %vm270_vm1, %v932_v7  ;;  %1157 = vmatmul.msk.f32.gmra.mxu3 %vm270_vm1, %v932_v7 }
  0x96   : > { %992 = vmatpush.msrb.mxu0 %v914_v8  ;;  %1166 = vmatpush.msrb.mxu1 %v914_v8 }
  0x98   : > { %993 = vmatpush.msrb.mxu0 %v911_v2  ;;  %1167 = vmatpush.msrb.mxu1 %v911_v2 }
  0x9a   : > { %994 = vmatpush.msrb.mxu0 %v908_v9  ;;  %1168 = vmatpush.msrb.mxu1 %v908_v9 }
  0x9c   : > { %995 = vmatpush.msrb.mxu0 %v905_v10  ;;  %1169 = vmatpush.msrb.mxu1 %v905_v10 }
  0x9e   : > { %996 = vmatpush.msrb.mxu0 %v902_v11  ;;  %1170 = vmatpush.msrb.mxu1 %v902_v11 }
  0xa0   : > { %997 = vmatpush.msrb.mxu0 %v899_v12  ;;  %1171 = vmatpush.msrb.mxu1 %v899_v12 }
  0xa2   : > { %998 = vmatpush.msrb.mxu0 %v896_v13  ;;  %1172 = vmatpush.msrb.mxu1 %v896_v13 }
  0xa3   : > { %1158 = vmatmul.msk.f32.vlgmr.msrb.gmra.mxu0 %vm270_vm1, %v930_v3  ;;  %1159 = vmatmul.msk.f32.vlgmr.msrb.gmra.mxu1 %vm270_vm1, %v932_v7 }
  0xa7   : > { %v292_v14 = vpop.f32.mrf.mxu0 }
  0xab   : > { %v315_v15 = vpop.f32.mrf.mxu1 }
  0xac   : > { %v1394_v16 = vpop.f32.mrf.mxu2  ;;  %v365_v17 = vpop.f32.mrf.mxu3 }
  0xad   : > { %v366_v46 = vadd.f32 %v365_v17, %v292_v14 }
  0xb1   : > { %v295_v18 = vpop.f32.mrf.mxu0 }
  0xb5   : > { %v318_v19 = vpop.f32.mrf.mxu1 }
  0xb6   : > { %v1396_v20 = vpop.f32.mrf.mxu2  ;;  %v368_v21 = vpop.f32.mrf.mxu3 }
  0xb7   : > { %v369_v58 = vadd.f32 %v368_v21, %v295_v18 }
  0xbd   : > { %v388_v22 = vpop.f32.mrf.mxu0 }
  0xbe   : > { %v389_v47 = vadd.f32 %v388_v22, %v315_v15 }
  0xc0   : > { %v478_v24 = vpop.f32.mrf.mxu2  ;;  %v501_v25 = vpop.f32.mrf.mxu3 }
  0xc1   : > { %v411_v23 = vpop.f32.mrf.mxu1  ;;  %v530_v50 = vadd.f32 %v478_v24, %v366_v46  ;;  %v531_v51 = vadd.f32 %v501_v25, %v389_v47 }
  0xc2   : > { %v412_v14 = vadd.f32 %v411_v23, %v1394_v16 }
  0xca   : > { %v481_v28 = vpop.f32.mrf.mxu2 }
  0xcb   : > { %v391_v26 = vpop.f32.mrf.mxu0  ;;  %v414_v27 = vpop.f32.mrf.mxu1  ;;  %v533_v4 = vadd.f32 %v481_v28, %v369_v58 }
  0xcc   : > { %v392_v59 = vadd.f32 %v391_v26, %v318_v19  ;;  %v415_v15 = vadd.f32 %v414_v27, %v1396_v20 }
  0xcd   : > { %v504_v29 = vpop.f32.mrf.mxu3 }
  0xce   : > { %v534_v5 = vadd.f32 %v504_v29, %v392_v59 }
  0xd4   : > { %v524_v30 = vpop.f32.mrf.mxu0  ;;  %v597_v31 = vpop.f32.mrf.mxu1 }
  0xd5   : > { %v649_v52 = vadd.f32 %v597_v31, %v530_v50  ;;  %v532_v24 = vadd.f32 %v524_v30, %v412_v14 }
  0xdb   : > { %v620_v32 = vpop.f32.mrf.mxu2  ;;  %v1398_v33 = vpop.f32.mrf.mxu3 }
  0xdc   : > { %v650_v53 = vadd.f32 %v620_v32, %v531_v51  ;;  %v651_v29 = vadd.f32 %v1398_v33, %v532_v24 }
  0xde   : > { %v527_v34 = vpop.f32.mrf.mxu0  ;;  %v600_v35 = vpop.f32.mrf.mxu1 }
  0xdf   : > { %v652_v8 = vadd.f32 %v600_v35, %v533_v4  ;;  %v535_v25 = vadd.f32 %v527_v34, %v415_v15 }
  0xe5   : > { %v623_v36 = vpop.f32.mrf.mxu2  ;;  %v646_v37 = vpop.f32.mrf.mxu3 }
  0xe6   : > { %v653_v2 = vadd.f32 %v623_v36, %v534_v5  ;;  %v654_v31 = vadd.f32 %v646_v37, %v535_v25 }
  0xee   : > { %v716_v38 = vpop.f32.mrf.mxu0  ;;  %v739_v39 = vpop.f32.mrf.mxu1 }
  0xef   : > { %v768_v56 = vadd.f32 %v716_v38, %v649_v52  ;;  %v769_v57 = vadd.f32 %v739_v39, %v650_v53  ;;  %v1016_v39 = vperm.slane %v1012_v55, 2 }
  0xf5   : > { %v762_v40 = vpop.f32.mrf.mxu2  ;;  %v835_v41 = vpop.f32.mrf.mxu3 }
  0xf6   : > { %v887_v61 = vadd.f32 %v835_v41, %v768_v56  ;;  %v770_v16 = vadd.f32 %v762_v40, %v651_v29 }
  0xf8   : > { %v719_v42 = vpop.f32.mrf.mxu0  ;;  %v742_v43 = vpop.f32.mrf.mxu1 }
  0xf9   : > { %v771_v12 = vadd.f32 %v719_v42, %v652_v8  ;;  %v772_v13 = vadd.f32 %v742_v43, %v653_v2 }
  0xff   : > { %v765_v48 = vpop.f32.mrf.mxu2  ;;  %v838_v49 = vpop.f32.mrf.mxu3 }
 0x100   : > { %v890_v17 = vadd.f32 %v838_v49, %v771_v12  ;;  %v773_v23 = vadd.f32 %v765_v48, %v654_v31 }
 0x108   : > { %v858_v54 = vpop.f32.mrf.mxu0  ;;  %v881_v60 = vpop.f32.mrf.mxu1 }
 0x109   : > { %v888_v62 = vadd.f32 %v858_v54, %v769_v57  ;;  %v889_v36 = vadd.f32 %v881_v60, %v770_v16 }
 0x10f   : > { %v954_v1 = vpop.f32.mrf.mxu2  ;;  %v977_v3 = vpop.f32.mrf.mxu3 }
 0x110   : > { %v1006_v44 = vadd.f32 %v954_v1, %v887_v61  ;;  %v1007_v45 = vadd.f32 %v977_v3, %v888_v62 }
 0x111   : > { %v861_v11 = vpop.f32.mrf.mxu0  ;;  %v884_v19 = vpop.f32.mrf.mxu1 }
 0x112   : > { %v1020_v6 = vadd.f32 %v1014_v63, %v1006_v44  ;;  %v1021_v7 = vadd.f32 %v1015_v0, %v1007_v45  ;;  %v891_v18 = vadd.f32 %v861_v11, %v772_v13  ;;  %v892_v38 = vadd.f32 %v884_v19, %v773_v23 }
 0x114   : > { %v1026_v9 = vmax.f32 %v1020_v6, 0.0  ;;  %v1027_v10 = vmax.f32 %v1021_v7, 0.0 }
 0x116   : > { %1032 = vst [vmem:[%s1407_s5] sm:$0xff] %v1026_v9 }
 0x117   : > { %1033 = vst [vmem:[%s1407_s5 + $0x8] sm:$0xff] %v1027_v10 }
 0x118   : > { %v957_v21 = vpop.f32.mrf.mxu2  ;;  %v980_v22 = vpop.f32.mrf.mxu3 }
 0x119   : > { %v1009_v26 = vadd.f32 %v957_v21, %v890_v17  ;;  %v1010_v28 = vadd.f32 %v980_v22, %v891_v18 }
 0x11b   : > { %v1023_v32 = vadd.f32 %v1014_v63, %v1009_v26  ;;  %v1024_v35 = vadd.f32 %v1015_v0, %v1010_v28 }
 0x11d   : > { %v1029_v20 = vmax.f32 %v1023_v32, 0.0  ;;  %v1030_v27 = vmax.f32 %v1024_v35, 0.0 }
 0x11f   : > { %1035 = vst [vmem:[%s1407_s5 + $0x18] sm:$0xff] %v1029_v20 }
 0x120   : > { %1036 = vst [vmem:[%s1407_s5 + $0x20] sm:$0xff] %v1030_v27  ;;  %v1000_v30 = vpop.f32.mrf.mxu0  ;;  %v1003_v34 = vpop.f32.mrf.mxu1 }
 0x121   : > { %v1008_v41 = vadd.f32 %v1000_v30, %v889_v36  ;;  %v1011_v42 = vadd.f32 %v1003_v34, %v892_v38 }
 0x123   : > { %v1022_v43 = vadd.f32 %v1016_v39, %v1008_v41  ;;  %v1025_v33 = vadd.f32 %v1016_v39, %v1011_v42 }
 0x125   : > { %v1028_v37 = vmax.f32 %v1022_v43, 0.0  ;;  %v1031_v46 = vmax.f32 %v1025_v33, 0.0 }
 0x127   : > { %1034 = vst [vmem:[%s1407_s5 + $0x10] sm:$0xff] %v1028_v37 }
 0x128   : > { %1037 = vst [vmem:[%s1407_s5 + $0x28] sm:$0xff] %v1031_v46 }
 0x129 PF: > { %s14_s12 = sadd.s32 1, %s1236_s12  }
 0x12a   : > { %p11_p8 = scmp.ge.s32.totalorder %s14_s12, 4  }
 0x12c   :  { %13 = sbr.rel (!%p11_p8) target bundleno = 1 (0x1), region = 73 }
 0x131   :  { %1062 = vsyncpa [#allocation3], 1 }
 0x132   :  { %1064 = vsyncpa [#allocation3 + $0x1], 1 }

</bundles_post_ra>
